<compile_context>
chip_gen: v7x
topology: tpu7x:2x2x1
jax: 0.10.0
libtpu: 0.0.40
codegen_flags: <defaults>
</compile_context>

<pallas_src>
import functools

import jax
import jax.numpy as jnp
from jax.experimental import pallas as pl
from jax.experimental.pallas import tpu as pltpu


def _round_up(x, m):
    return ((x + m - 1) // m) * m


def _vmem_capacity_bytes():
    try:
        info = pltpu.get_tpu_info()
        return int(getattr(info, "vmem_capacity_bytes", 64 << 20))
    except Exception:
        return 64 << 20


# ---------------------------------------------------------------------------
# Phase 1: per-batch coordinate normalization + flat voxel ids (grid = (B,)).
# ---------------------------------------------------------------------------
def _normalize_kernel(coord_ref, nc_ref, flat_ref, *, r, normalize, eps):
    c = coord_ref[0]                                          # (3, N) f32
    mean = jnp.mean(c, axis=1, keepdims=True)                 # (3, 1)
    nc = c - mean
    if normalize:
        nrm = jnp.sqrt(jnp.sum(nc * nc, axis=0, keepdims=True))   # (1, N)
        mx = jnp.max(nrm, axis=1, keepdims=True)                  # (1, 1)
        # Hoisted scalar reciprocal (divides by zero if all points coincide
        # and eps == 0, matching the PyTorch reference).
        nc = nc * (1.0 / (mx * 2.0 + eps)) + 0.5
    else:
        nc = (nc + 1.0) * 0.5
    nc = jnp.clip(nc * float(r), 0.0, float(r - 1))
    nc_ref[0] = nc.astype(nc_ref.dtype)

    vi = jnp.round(nc).astype(jnp.int32)                      # (3, N)
    flat_ref[0, 0] = vi[0] * (r * r) + vi[1] * r + vi[2]      # (N,)


# ---------------------------------------------------------------------------
# Phase 2: scatter-average via a tiled one-hot matmul (grid = (B, Vt, Nc)).
# ---------------------------------------------------------------------------
def _scatter_kernel(flat_ref, feat_ref, vox_ref, *, v_tile, c_pad, n_chunks):
    vt = pl.program_id(1)
    n = pl.program_id(2)

    @pl.when(n == 0)
    def _():
        vox_ref[...] = jnp.zeros_like(vox_ref)

    flat = flat_ref[0, 0]                           # (NC,) int32, lane-major
    nc = flat.shape[0]
    v_base = vt * v_tile
    # Transposed one-hot: voxel index on sublanes, point index on lanes, so
    # the lane-major flat ids broadcast along sublanes with no relayout.
    # (The iota is regenerated per step; Mosaic folds it to constant vregs.)
    ids = jax.lax.broadcasted_iota(jnp.int32, (v_tile, nc), 0)
    onehot_t = ((flat - v_base)[None, :] == ids).astype(jnp.bfloat16)  # (VT, NC)

    lhs = feat_ref[0]                               # (2*C_pad, NC) bf16: [hi; lo]
    res = jax.lax.dot_general(                      # MXU: contract last dims
        lhs, onehot_t,
        dimension_numbers=(((1,), (1,)), ((), ())),
        preferred_element_type=jnp.float32)         # (2*C_pad, VT) f32
    vox_ref[0] = vox_ref[0] + (res[:c_pad] + res[c_pad:])

    @pl.when(n == n_chunks - 1)
    def _():
        acc = vox_ref[0]                            # (C_pad, VT); last row = counts
        cnt = jnp.maximum(acc[c_pad - 1:c_pad, :], 1.0)
        inv = pl.reciprocal(cnt, approx=True)       # EUP slot
        inv = inv * (2.0 - cnt * inv)               # one Newton step
        vox_ref[0] = acc * inv


def voxelization(features, coords, resolution, normalize=True, eps=0.0,
                 v_tile=None, n_chunk=1024):
    """Pallas TPU forward pass of the Voxelization module.

    Args:
      features: (B, C, N) float32
      coords:   (B, 3, N) float32
      resolution: int R
    Returns:
      (voxel_features (B, C, R, R, R), norm_coords (B, 3, N))
    """
    B, C, N = features.shape
    assert coords.shape == (B, 3, N)
    r = int(resolution)
    V = r * r * r

    vmem_cap = _vmem_capacity_bytes()
    if v_tile is None:
        v_tile = 1024 if vmem_cap > (64 << 20) else 512   # v5e/v6e vs v7x

    VT = min(_round_up(V, 128), _round_up(v_tile, 128))   # lane-dense V tile
    V_pad = _round_up(V, VT)
    NC = min(_round_up(N, 128), _round_up(n_chunk, 128))  # lane-aligned N chunk
    N_pad = _round_up(N, NC)
    n_chunks = N_pad // NC
    n_v_tiles = V_pad // VT
    C_pad = _round_up(C + 1, 8)        # features + ones(count) row, sublane-aligned

    coords = coords.astype(jnp.float32)

    # ---------------- phase 1: normalization + flat voxel ids ----------------
    norm_coords, flat = pl.pallas_call(
        functools.partial(_normalize_kernel, r=r, normalize=normalize,
                          eps=float(eps)),
        out_shape=(
            jax.ShapeDtypeStruct((B, 3, N), jnp.float32),
            jax.ShapeDtypeStruct((B, 1, N), jnp.int32),
        ),
        grid_spec=pltpu.PrefetchScalarGridSpec(
            num_scalar_prefetch=0,
            grid=(B,),
            in_specs=[pl.BlockSpec((1, 3, N), lambda b: (b, 0, 0))],
            out_specs=[
                pl.BlockSpec((1, 3, N), lambda b: (b, 0, 0)),
                pl.BlockSpec((1, 1, N), lambda b: (b, 0, 0)),
            ],
        ),
        compiler_params=pltpu.CompilerParams(
            dimension_semantics=("parallel",)),
    )(coords)

    # Pad N: sentinel flat id -1 never matches any voxel id in [0, V).
    if N_pad != N:
        flat = jnp.pad(flat, ((0, 0), (0, 0), (0, N_pad - N)),
                       constant_values=-1)

    # ------ host-side feature prep: pad channels, fuse the count row, --------
    # ------ split f32 -> stacked hi/lo bf16 for native bf16 MXU dots. --------
    ext = jnp.zeros((B, C_pad, N_pad), jnp.float32)
    ext = ext.at[:, :C, :N].set(features.astype(jnp.float32))
    ext = ext.at[:, C_pad - 1, :N].set(1.0)               # count row (exact in bf16)
    hi = ext.astype(jnp.bfloat16)
    lo = (ext - hi.astype(jnp.float32)).astype(jnp.bfloat16)
    feats2 = jnp.concatenate([hi, lo], axis=1)            # (B, 2*C_pad, N_pad)

    # ---- VMEM budget: double-buffered blocks + one-hot temporaries, ---------
    # ---- capped with headroom below the chip's physical VMEM. ---------------
    est = (
        2 * 2 * (2 * C_pad) * NC          # feats2 blocks (bf16, double-buffered)
        + 2 * 8 * NC * 4                  # flat blocks (sublane-padded int32)
        + 2 * C_pad * VT * 4              # resident output blocks
        + 3 * VT * NC * 4                 # iota / compare / bf16 one-hot temps
        + 2 * (2 * C_pad) * VT * 4        # dot result + hi+lo sum
    )
    vmem_limit = int(min(max(2 * est, 32 << 20), int(0.85 * vmem_cap)))

    kernel = functools.partial(_scatter_kernel, v_tile=VT, c_pad=C_pad,
                               n_chunks=n_chunks)

    vox = pl.pallas_call(
        kernel,
        out_shape=jax.ShapeDtypeStruct((B, C_pad, V_pad), jnp.float32),
        grid_spec=pltpu.PrefetchScalarGridSpec(
            num_scalar_prefetch=0,
            grid=(B, n_v_tiles, n_chunks),
            in_specs=[
                pl.BlockSpec((1, 1, NC), lambda b, vt, n: (b, 0, n)),
                pl.BlockSpec((1, 2 * C_pad, NC), lambda b, vt, n: (b, 0, n)),
            ],
            out_specs=pl.BlockSpec((1, C_pad, VT), lambda b, vt, n: (b, 0, vt)),
        ),
        compiler_params=pltpu.CompilerParams(
            # Batch and V-tile axes are independent (megacore-shardable);
            # the N-chunk axis accumulates into the resident output block.
            dimension_semantics=("parallel", "parallel", "arbitrary"),
            vmem_limit_bytes=vmem_limit,
        ),
    )(flat, feats2)

    return vox[:, :C, :V].reshape(B, C, r, r, r), norm_coords


def _reference(features, coords, resolution, normalize=True, eps=0.0):
    """Plain-JAX reference for correctness checking."""
    r = int(resolution)
    B, C, N = features.shape
    mean = jnp.mean(coords, axis=2, keepdims=True)
    nc = coords - mean
    if normalize:
        nrm = jnp.linalg.norm(nc, axis=1, keepdims=True)
        mx = jnp.max(nrm, axis=2, keepdims=True)
        nc = nc / (mx * 2.0 + eps) + 0.5
    else:
        nc = (nc + 1.0) / 2.0
    nc = jnp.clip(nc * r, 0.0, r - 1.0)
    vox_i = jnp.round(nc).astype(jnp.int32)
    flat = vox_i[:, 0] * (r * r) + vox_i[:, 1] * r + vox_i[:, 2]   # (B, N)
    onehot = jax.nn.one_hot(flat, r * r * r, dtype=jnp.float32)    # (B, N, V)
    sums = jnp.einsum("bcn,bnv->bcv", features, onehot)
    counts = jnp.sum(onehot, axis=1)                               # (B, V)
    avg = sums / jnp.maximum(counts, 1.0)[:, None, :]
    return avg.reshape(B, C, r, r, r), nc


if __name__ == "__main__":
    key = jax.random.PRNGKey(0)
    k1, k2 = jax.random.split(key)

    B, C, N = 2, 16, 128
    R = 4

    features = jax.random.normal(k1, (B, C, N), dtype=jnp.float32)
    coords = jax.random.normal(k2, (B, 3, N), dtype=jnp.float32)

    vox, nc = voxelization(features, coords, R, normalize=True, eps=0.0)
    vox = jax.block_until_ready(vox)
    nc = jax.block_until_ready(nc)

    vox_ref, nc_ref = _reference(features, coords, R, normalize=True, eps=0.0)

    assert vox.shape == (B, C, R, R, R)
    assert nc.shape == (B, 3, N)
    assert jnp.allclose(vox, vox_ref, atol=1e-4, rtol=1e-4)
    assert jnp.allclose(nc, nc_ref, atol=1e-5, rtol=1e-5)

    print("KERNEL_OK")
</pallas_src>

<mosaic_0001>
module attributes {stable_mosaic.version = 11 : i64} {
  func.func @_normalize_kernel(%arg0: i32, %arg1: memref<1x3x128xf32, #tpu.memory_space<vmem>>, %arg2: memref<1x3x128xf32, #tpu.memory_space<vmem>>, %arg3: memref<1x1x128xi32, #tpu.memory_space<vmem>>) attributes {dimension_semantics = [#tpu.dimension_semantics<parallel>], iteration_bounds = array<i64: 2>, scalar_prefetch = 0 : i64, scratch_operands = 0 : i64, tpu.core_type = #tpu.core_type<tc>, window_params = [{transform_indices = @transform_0, window_bounds = array<i64: 1, 3, 128>}, {transform_indices = @transform_1, window_bounds = array<i64: 1, 3, 128>}, {transform_indices = @transform_2, window_bounds = array<i64: 1, 1, 128>}]} {
    %c0 = arith.constant 0 : index
    %c0_0 = arith.constant 0 : index
    %c0_1 = arith.constant 0 : index
    %0 = vector.load %arg1[%c0, %c0_0, %c0_1] : memref<1x3x128xf32, #tpu.memory_space<vmem>>, vector<1x3x128xf32>
    %1 = vector.shape_cast %0 : vector<1x3x128xf32> to vector<3x128xf32>
    %cst = arith.constant dense<0.000000e+00> : vector<3xf32>
    %2 = vector.multi_reduction <add>, %1, %cst [1] : vector<3x128xf32> to vector<3xf32>
    %3 = vector.shape_cast %2 : vector<3xf32> to vector<3x1xf32>
    %cst_2 = arith.constant 1.280000e+02 : f32
    %4 = vector.broadcast %cst_2 : f32 to vector<3x1xf32>
    %5 = arith.divf %3, %4 : vector<3x1xf32>
    %6 = vector.broadcast %5 : vector<3x1xf32> to vector<3x128xf32>
    %7 = arith.subf %1, %6 : vector<3x128xf32>
    %8 = arith.mulf %7, %7 : vector<3x128xf32>
    %cst_3 = arith.constant dense<0.000000e+00> : vector<128xf32>
    %9 = vector.multi_reduction <add>, %8, %cst_3 [0] : vector<3x128xf32> to vector<128xf32>
    %10 = vector.shape_cast %9 : vector<128xf32> to vector<1x128xf32>
    %11 = math.sqrt %10 : vector<1x128xf32>
    %cst_4 = arith.constant dense<0xFF800000> : vector<1xf32>
    %12 = vector.multi_reduction <maximumf>, %11, %cst_4 [1] : vector<1x128xf32> to vector<1xf32>
    %13 = vector.shape_cast %12 : vector<1xf32> to vector<1x1xf32>
    %cst_5 = arith.constant 2.000000e+00 : f32
    %14 = vector.broadcast %cst_5 : f32 to vector<1x1xf32>
    %15 = arith.mulf %13, %14 : vector<1x1xf32>
    %cst_6 = arith.constant 0.000000e+00 : f32
    %16 = vector.broadcast %cst_6 : f32 to vector<1x1xf32>
    %17 = arith.addf %15, %16 : vector<1x1xf32>
    %cst_7 = arith.constant 1.000000e+00 : f32
    %18 = vector.broadcast %cst_7 : f32 to vector<1x1xf32>
    %19 = arith.divf %18, %17 : vector<1x1xf32>
    %20 = vector.broadcast %19 : vector<1x1xf32> to vector<3x128xf32>
    %21 = arith.mulf %7, %20 : vector<3x128xf32>
    %cst_8 = arith.constant 5.000000e-01 : f32
    %22 = vector.broadcast %cst_8 : f32 to vector<3x128xf32>
    %23 = arith.addf %21, %22 : vector<3x128xf32>
    %cst_9 = arith.constant 4.000000e+00 : f32
    %24 = vector.broadcast %cst_9 : f32 to vector<3x128xf32>
    %25 = arith.mulf %23, %24 : vector<3x128xf32>
    %cst_10 = arith.constant 0.000000e+00 : f32
    %cst_11 = arith.constant 3.000000e+00 : f32
    %26 = vector.broadcast %cst_10 : f32 to vector<3x128xf32>
    %27 = arith.maximumf %26, %25 : vector<3x128xf32>
    %28 = vector.broadcast %cst_11 : f32 to vector<3x128xf32>
    %29 = arith.minimumf %28, %27 : vector<3x128xf32>
    %c0_12 = arith.constant 0 : index
    %c0_13 = arith.constant 0 : index
    %c0_14 = arith.constant 0 : index
    %30 = vector.load %arg2[%c0_12, %c0_13, %c0_14] : memref<1x3x128xf32, #tpu.memory_space<vmem>>, vector<1x3x128xf32>
    %31 = vector.shape_cast %30 : vector<1x3x128xf32> to vector<3x128xf32>
    %32 = vector.shape_cast %29 : vector<3x128xf32> to vector<1x3x128xf32>
    tpu.vector_store %arg2[%c0_12, %c0_13, %c0_14], %32 {strides = array<i32>} : memref<1x3x128xf32, #tpu.memory_space<vmem>>, vector<1x3x128xf32>,
    %33 = math.roundeven %29 : vector<3x128xf32>
    %34 = arith.fptosi %33 : vector<3x128xf32> to vector<3x128xi32>
    %35 = vector.extract_strided_slice %34 {offsets = [0, 0], sizes = [1, 128], strides = [1, 1]} : vector<3x128xi32> to vector<1x128xi32>
    %36 = vector.shape_cast %35 : vector<1x128xi32> to vector<128xi32>
    %c16_i32 = arith.constant 16 : i32
    %37 = vector.broadcast %c16_i32 : i32 to vector<128xi32>
    %38 = arith.muli %36, %37 : vector<128xi32>
    %39 = vector.extract_strided_slice %34 {offsets = [1, 0], sizes = [1, 128], strides = [1, 1]} : vector<3x128xi32> to vector<1x128xi32>
    %40 = vector.shape_cast %39 : vector<1x128xi32> to vector<128xi32>
    %c4_i32 = arith.constant 4 : i32
    %41 = vector.broadcast %c4_i32 : i32 to vector<128xi32>
    %42 = arith.muli %40, %41 : vector<128xi32>
    %43 = arith.addi %38, %42 : vector<128xi32>
    %44 = vector.extract_strided_slice %34 {offsets = [2, 0], sizes = [1, 128], strides = [1, 1]} : vector<3x128xi32> to vector<1x128xi32>
    %45 = vector.shape_cast %44 : vector<1x128xi32> to vector<128xi32>
    %46 = arith.addi %43, %45 : vector<128xi32>
    %c0_15 = arith.constant 0 : index
    %c0_16 = arith.constant 0 : index
    %c0_17 = arith.constant 0 : index
    %47 = vector.load %arg3[%c0_15, %c0_16, %c0_17] : memref<1x1x128xi32, #tpu.memory_space<vmem>>, vector<1x1x128xi32>
    %48 = vector.shape_cast %47 : vector<1x1x128xi32> to vector<128xi32>
    %49 = vector.shape_cast %46 : vector<128xi32> to vector<1x1x128xi32>
    tpu.vector_store %arg3[%c0_15, %c0_16, %c0_17], %49 {strides = array<i32>} : memref<1x1x128xi32, #tpu.memory_space<vmem>>, vector<1x1x128xi32>,
    return
  }
  func.func @transform_0(%arg0: i32) -> (i32, i32, i32) {
    %c0_i32 = arith.constant 0 : i32
    %c0_i32_0 = arith.constant 0 : i32
    %c0_i32_1 = arith.constant 0 : i32
    return %arg0, %c0_i32, %c0_i32_0 : i32, i32, i32
  }
  func.func @transform_1(%arg0: i32) -> (i32, i32, i32) {
    %c0_i32 = arith.constant 0 : i32
    %c0_i32_0 = arith.constant 0 : i32
    %c0_i32_1 = arith.constant 0 : i32
    return %arg0, %c0_i32, %c0_i32_0 : i32, i32, i32
  }
  func.func @transform_2(%arg0: i32) -> (i32, i32, i32) {
    %c0_i32 = arith.constant 0 : i32
    %c0_i32_0 = arith.constant 0 : i32
    %c0_i32_1 = arith.constant 0 : i32
    return %arg0, %c0_i32, %c0_i32_0 : i32, i32, i32
  }
}

</mosaic_0001>

<bundles_post_ra>
// kernel: tpu_custom_call.1
= control target key start
LH: loop header
LB: loop body
LE: loop exit
PB: predicated region body
PF: predicated region fallthrough
CT: control target
= control target key end

     0   :  { %8 = vsyncpa [#allocation3], 0  ;;  %s536_s0 = inlined_call_operand.vmem [shape: f32[2,3,128], index: 0, kind: input, shape index: {}]   ;;  %s537_s1 = inlined_call_operand.vmem [shape: f32[2,3,128], index: 1, kind: output, shape index: {0}]   ;;  %s538_s2 = inlined_call_operand.hbm [shape: s32[2,1,128], index: 2, kind: output, shape index: {1}]  }
   0x1   :  { %10 = vsyncpa [#allocation3 + $0x1], 0  ;;  %s426_s9 = smov 0   ;;  %s428_s10 = smov 0  }
   0x2   :  { %s430_s11 = smov 0   ;;  %s432_s12 = smov 0  }
   0x3 LB: > { %s447_s13 = sadd.s32 4294967295, %s408_s12   ;;  %s291_s14 = sadd.s32 4294967294, %s408_s12   ;;  %s408_s12 = sphi %s432_s12, %s544_s12   ;;  %s404_s11 = sphi %s430_s11, %s543_s11   ;;  %s400_s10 = sphi %s428_s10, %s542_s10   ;;  %s396_s9 = sphi %s426_s9, %s541_s9  }
   0x4   : > { %s451_s15 = sadd.s32 1, %s408_s12   ;;  %s75_s16 = sadd.s32 1, %s404_s11 }
   0x5   : > { %s72_s17 = ssub.s32 %s408_s12, %s451_s15  ;;  %p85_p0 = scmp.ne.s32.totalorder %s404_s11, %s400_s10 }
   0x6   : > { %p73_p1 = scmp.eq.s32.totalorder %s72_s17, 0  ;;  %p86_p2 = scmp.eq.s32.totalorder %s447_s13, 1 }
   0x7   : > { %p91_p3 = scmp.ne.s32.totalorder %s400_s10, %s396_s9  ;;  %p92_p4 = scmp.eq.s32.totalorder %s291_s14, 1 }
   0x8   : > { %s462_s18 = scalar_select %p73_p1, %s404_s11, %s75_s16  }
   0x9   : > { %p464_p5 = por %p86_p2, %p85_p0  ;;  %p468_p6 = por %p92_p4, %p91_p3 }
   0xa   : > { %p294_p7 = scmp.ge.s32.totalorder %s408_s12, 1  ;;  %p117_p8 = scmp.lt.s32.totalorder %s408_s12, 3 }
   0xc   : > { %p118_p9 = pnand %p294_p7, %p117_p8 }
   0xd   : > { %p141_p10 = scmp.lt.s32.totalorder (!%p118_p9), %s447_s13, 1  ;;  %vm150_vm0 = vcmask (!%p118_p9), 1042432   ;;  %s139_s29 = sand.u32 (!%p118_p9), 1, %s400_s10  }
   0xe   : > { %121 = sbr.rel (%p118_p9) target bundleno = 392 (0x188), region = 24  ;;  %s297_s30 = sshll.u32 (!%p118_p9), %s447_s13, 4 }
   0xf   : > { %s140_s3 = scalar_lea.vmem (!%p118_p9), [#allocation2], %s139_s29  ;;  %s494_s7 = scalar_lea.hbm (!%p118_p9), %s538_s2, %s297_s30 }
  0x10   : > { %s212_s4 = sshll.u32 (!%p118_p9), %s140_s3, 4  ;;  %s197_s8 = scalar_lea.sflag (!%p118_p9), [#allocation3], %s139_s29  ;;  %s496_s4 = int_to_ptr.vmem [resolvable:$true] %s212_s4 }
  0x11   : > { %s346_s14 = scalar_lea.vmem (!%p118_p9), %s496_s4, 16 }
  0x12   : > { %p347_p11 = scmp.ne.s32.totalorder (!%p118_p9), %s496_s4, %s346_s14 }
  0x14   : > { %p348_p12 = pnand (!%p118_p9), %p347_p11, %p464_p5 }
  0x15   : > { %s476_s21 = scalar_select %p141_p10, %s447_s13, 1 }
  0x16   : > { %p349_p13 = pneg %p348_p12  ;;  %s410_s13 = smov [#allocation2]  }
  0x17   : > { %s295_s22 = sshll.u32 %s476_s21, 2  ;;  %s350_s16 = sshll.u32 %s410_s13, 4  ;;  %s351_s16 = int_to_ptr.vmem [resolvable:$false] %s350_s16 }
  0x18   : > { %s144_s25 = scalar_lea.vmem %s536_s0, %s295_s22  ;;  %s148_s28 = scalar_lea.vmem %s537_s1, %s295_s22 }
  0x19   : > { %v149_v0 = vld [vmem:[%s144_s25] sm:$0x7]  ;;  %s352_s17 = scalar_lea.vmem %s351_s16, 32  ;;  %p353_p0 = scmp.lt.s32.totalorder %s496_s4, %s351_s16 }
  0x1a   : > { %v151_v1 = vsel %vm150_vm0, %v149_v0, 0.0  ;;  %p354_p1 = scmp.lt.s32.totalorder %s352_s17, %s346_s14 }
  0x1b   : > { %152 = vadd.xlane.f32.xlu0 %v151_v1 }
  0x1c   : > { %p355_p2 = por %p354_p1, %p353_p0 }
  0x1e   : > { %p356_p3 = pnand %p355_p2, %p349_p13 }
  0xa8   : > { %v153_v2 = vpop.xlane.xlu0 %152 }
  0xa9   : > { %v155_v3 = vmul.f32 0.0078125, %v153_v2 }
  0xab   : > { %v156_v4 = vsub.f32 %v149_v0, %v155_v3 }
  0xad   : > { %v157_v5 = vmul.f32 %v156_v4, %v156_v4 }
  0xaf   : > { %v158_v6 = vsel %vm150_vm0, %v157_v5, 0.0 }
  0xb0   : > { %v159_v7 = vrot.slane %v158_v6, 4 }
  0xb2   : > { %v160_v8 = vadd.f32 %v159_v7, %v158_v6 }
  0xb4   : > { %v161_v9 = vrot.slane %v160_v8, 2 }
  0xb6   : > { %v162_v10 = vadd.f32 %v161_v9, %v160_v8 }
  0xb8   : > { %v163_v11 = vrot.slane %v162_v10, 1 }
  0xba   : > { %v164_v12 = vadd.f32 %v163_v11, %v162_v10 }
  0xbc   : > { %342 = vrsqrt.f32 %v164_v12  ;;  %vm167_vm1 = vcmp.eq.f32.partialorder %v164_v12, inf  ;;  %v170_v15 = vand.u32 2147483648, %v164_v12  ;;  %vm169_vm2 = vcmp.eq.f32.partialorder %v164_v12, 0.0 }
  0xc6   : > { %v343_v13 = vpop.eup %342 }
  0xc7   : > { %v166_v14 = vmul.f32 %v343_v13, %v164_v12 }
  0xc9   : > { %v168_v16 = vsel %vm167_vm1, %v164_v12, %v166_v14 }
  0xca   : > { %v171_v17 = vsel %vm169_vm2, %v170_v15, %v168_v16 }
  0xcb   : > { %172 = vmax.xlane.f32.xlu0 %v171_v17 }
 0x158   : > { %v173_v18 = vpop.xlane.xlu0 %172 }
 0x159   : > { %v174_v19 = vmul.f32 2.0, %v173_v18 }
 0x15b   : > { %344 = vrcp.f32 %v174_v19 }
 0x165   : > { %v345_v20 = vpop.eup %344 }
 0x166   : > { %v178_v21 = vmul.f32 %v345_v20, %v156_v4 }
 0x168   : > { %v179_v22 = vadd.f32 0.5, %v178_v21 }
 0x16a   : > { %v180_v23 = vmul.f32 4.0, %v179_v22 }
 0x16c   : > { %v181_v24 = vmax.f32 %v180_v23, 0.0 }
 0x16e   : > { %v182_v25 = vmin.f32 %v181_v24, 3.0 }
 0x170   : > { %183 = vst [vmem:[%s148_s28] sm:$0x7] %v182_v25  ;;  %v302_v26 = vcvt.f32.s32 %v182_v25 }
 0x172   : > { %v186_v27 = vmul.u32 4, %v302_v26  ;;  %v185_v28 = vmul.u32 16, %v302_v26  ;;  %v189_v31 = vrot.slane %v302_v26, 2 }
 0x174   : > { %v187_v29 = vrot.slane %v186_v27, 1 }
 0x176   : > { %v188_v30 = vadd.s32 %v187_v29, %v185_v28 }
 0x178   : > { %v190_v32 = vadd.s32 %v189_v31, %v188_v30 }
 0x17a   : > { %191 = vst [vmem:[%s140_s3] sm:$0x1] %v190_v32 }
 0x17b   : > { %359 = shalt.err (!%p356_p3)
}
 0x17c   : > { %s360_s21 = scalar_lea.hbm %s494_s7, 16  ;;  %s364_s24 = scalar_lea.hbm %s538_s2, 32 }
 0x17d   : > { %p361_p4 = scmp.ne.s32.totalorder %s494_s7, %s360_s21  ;;  %p365_p9 = scmp.lt.u32.totalorder %s494_s7, %s538_s2 }
 0x17e   : > { %p366_p10 = scmp.lt.u32.totalorder %s364_s24, %s360_s21  ;;  %p368_p12 = scmp.lt.u32.totalorder %s360_s21, %s494_s7 }
 0x17f   : > { %p362_p7 = pnand %p361_p4, %p464_p5 }
 0x180   : > { %p367_p11 = por %p366_p10, %p365_p9 }
 0x181   : > { %p363_p8 = pneg %p362_p7 }
 0x182   : > { %p369_p13 = por %p368_p12, %p367_p11 }
 0x184   : > { %p370_p0 = pnand %p369_p13, %p363_p8 }
 0x186   : > { %373 = shalt.err (!%p370_p0)
}
 0x187   : > { %303 = dma.vmem_to_hbm [thread:$0]  (%p464_p5), %s496_s4, 16, %s494_s7, %s197_s8  }
 0x188 PF: > { %p309_p1 = scmp.ge.s32.totalorder %s408_s12, 2  ;;  %s231_s27 = sand.u32 1, %s396_s9  }
 0x189   : > { %s232_s28 = scalar_lea.sflag [#allocation3], %s231_s27 }
 0x18a   : > { %p306_p2 = pnand %p309_p1, %p468_p6 }
 0x18c   : > { %391 = dma.done.wait (!%p306_p2), %s232_s28, 16  }
 0x18d   : > { %393 = vsyncadd (!%p306_p2), %s232_s28, 4294967280  ;;  %p13_p3 = scmp.ge.s32.totalorder %s451_s15, 4   ;;  %s541_s9 = smov %s400_s10 }
 0x18e   : > { %s542_s10 = smov %s404_s11  ;;  %s543_s11 = smov %s462_s18 }
 0x18f   : > { %s544_s12 = smov %s451_s15  ;;  %15 = sbr.rel (!%p13_p3) target bundleno = 3 (0x3), region = 71 }
 0x196   :  { %236 = vsyncpa [#allocation3], 1 }
 0x197   :  { %238 = vsyncpa [#allocation3 + $0x1], 1 }

</bundles_post_ra>
